<compile_context>
chip_gen: v7x
topology: tpu7x:2x2x1
jax: 0.10.0
libtpu: 0.0.40
codegen_flags: <defaults>
</compile_context>

<pallas_src>
import jax
import jax.numpy as jnp
from jax.experimental import pallas as pl
from jax.experimental.pallas import tpu as pltpu


def _shift_lane(img, offset):
    """y[:, :, j] = img[:, :, j+offset] with zero fill at the border (offset = +/-1)."""
    C, H, W = img.shape
    z = jnp.zeros((C, H, 1), img.dtype)
    if offset == 1:
        return jnp.concatenate([img[:, :, 1:], z], axis=2)
    return jnp.concatenate([z, img[:, :, :-1]], axis=2)


def _shift_sublane(img, offset):
    """y[:, i, :] = img[:, i+offset, :] with zero fill at the border (offset = +/-1)."""
    C, H, W = img.shape
    z = jnp.zeros((C, 1, W), img.dtype)
    if offset == 1:
        return jnp.concatenate([img[:, 1:, :], z], axis=1)
    return jnp.concatenate([z, img[:, :-1, :]], axis=1)


def _sobel_grad(img):
    """|sobel_x(img)| + |sobel_y(img)|, zero padding=1, separable form.

    kernelx = [1,2,1]^T (vertical)  x  [-1,0,1] (horizontal)
    kernely = [1,0,-1]^T (vertical) x  [ 1,2,1] (horizontal)
    img: (3, H, W) float32.
    """
    xl = _shift_lane(img, +1)      # x[i, j+1]
    xr = _shift_lane(img, -1)      # x[i, j-1]
    d = xl - xr                    # horizontal [-1, 0, 1]
    s = xr + 2.0 * img + xl        # horizontal [ 1, 2, 1]

    d_dn = _shift_sublane(d, -1)   # d[i-1]
    d_up = _shift_sublane(d, +1)   # d[i+1]
    s_dn = _shift_sublane(s, -1)   # s[i-1]
    s_up = _shift_sublane(s, +1)   # s[i+1]

    sobelx = d_dn + 2.0 * d + d_up   # vertical [1, 2, 1] on d
    sobely = s_dn - s_up             # vertical [1, 0, -1] on s
    return jnp.abs(sobelx) + jnp.abs(sobely)


def _content_loss_kernel(x_ref, y_ref, out_ref):
    # x_ref / y_ref blocks: (1, 3, H, W); out_ref block: (1, 8, 128).
    x = x_ref[0].astype(jnp.float32)   # (3, H, W)
    y = y_ref[0].astype(jnp.float32)   # (3, H, W)

    # intensity term: sum |x - y| over this batch's 3 channels
    s_in = jnp.sum(jnp.abs(x - y))

    # gradient term: sum |grad(x) - grad(y)|
    gx = _sobel_grad(x)
    gy = _sobel_grad(y)
    s_gr = jnp.sum(jnp.abs(gx - gy))

    # Write a lane-dense (8, 128) output tile; scalars placed at [0,0] / [0,1].
    row = jax.lax.broadcasted_iota(jnp.int32, (8, 128), 0)
    col = jax.lax.broadcasted_iota(jnp.int32, (8, 128), 1)
    tile = jnp.where(jnp.logical_and(row == 0, col == 0), s_in, 0.0)
    tile = tile + jnp.where(jnp.logical_and(row == 0, col == 1), s_gr, 0.0)
    out_ref[0] = tile


def content_loss(x, y):
    """Pallas implementation of ContentLoss.forward(x, y).

    x, y: (B, C, H, W) with C >= 3 (only the first 3 channels are used,
    mirroring the PyTorch `for c in range(3)` loop). Returns a scalar float32.
    """
    B, C, H, W = x.shape
    assert y.shape == x.shape and C >= 3
    if C > 3:
        x = x[:, :3]
        y = y[:, :3]

    in_spec = pl.BlockSpec((1, 3, H, W), lambda b: (b, 0, 0, 0))
    out_spec = pl.BlockSpec((1, 8, 128), lambda b: (b, 0, 0))

    itemsize = jnp.dtype(x.dtype).itemsize
    cost = pl.CostEstimate(
        flops=int(30 * B * 3 * H * W),
        transcendentals=0,
        bytes_accessed=int(2 * B * 3 * H * W * itemsize + B * 8 * 128 * 4),
    )

    partial = pl.pallas_call(
        _content_loss_kernel,
        out_shape=jax.ShapeDtypeStruct((B, 8, 128), jnp.float32),
        grid_spec=pltpu.PrefetchScalarGridSpec(
            num_scalar_prefetch=0,
            grid=(B,),
            in_specs=[in_spec, in_spec],
            out_specs=out_spec,
        ),
        compiler_params=pltpu.CompilerParams(
            dimension_semantics=("parallel",),
            vmem_limit_bytes=48 * 1024 * 1024,  # > 32 MiB default, < 64 MiB (v7x)
        ),
        cost_estimate=cost,
    )(x, y)

    # Each per-channel F.l1_loss is a mean over (B, 1, H, W) -> divide by B*H*W.
    denom = jnp.float32(B * H * W)
    total_loss_in = jnp.sum(partial[:, 0, 0]) / denom
    total_loss_grad = jnp.sum(partial[:, 0, 1]) / denom
    return total_loss_in + 10.0 * total_loss_grad


def _content_loss_ref(x, y):
    """Pure-JAX reference for correctness checking."""
    def grad(im):  # im: (B, H, W)
        p = jnp.pad(im, ((0, 0), (1, 1), (1, 1)))
        H, W = im.shape[1], im.shape[2]
        s = lambda di, dj: p[:, di:di + H, dj:dj + W]
        sx = (-s(0, 0) + s(0, 2)) + (-2 * s(1, 0) + 2 * s(1, 2)) + (-s(2, 0) + s(2, 2))
        sy = (s(0, 0) + 2 * s(0, 1) + s(0, 2)) - (s(2, 0) + 2 * s(2, 1) + s(2, 2))
        return jnp.abs(sx) + jnp.abs(sy)

    t_in = 0.0
    t_gr = 0.0
    for c in range(3):
        xc, yc = x[:, c, :, :], y[:, c, :, :]
        t_in = t_in + jnp.mean(jnp.abs(xc - yc))
        t_gr = t_gr + jnp.mean(jnp.abs(grad(xc) - grad(yc)))
    return t_in + 10.0 * t_gr


if __name__ == "__main__":
    key = jax.random.PRNGKey(0)
    kx, ky = jax.random.split(key)
    B, C, H, W = 2, 3, 16, 16
    x = jax.random.uniform(kx, (B, C, H, W), dtype=jnp.float32)
    y = jax.random.uniform(ky, (B, C, H, W), dtype=jnp.float32)

    out = jax.jit(content_loss)(x, y)
    out = jax.block_until_ready(out)

    ref = _content_loss_ref(x, y)
    assert jnp.allclose(out, ref, rtol=1e-4, atol=1e-4), (out, ref)

    print("KERNEL_OK")
</pallas_src>

<mosaic_0001>
module attributes {stable_mosaic.version = 11 : i64} {
  func.func @_content_loss_kernel(%arg0: i32, %arg1: memref<1x3x16x16xf32, #tpu.memory_space<vmem>>, %arg2: memref<1x3x16x16xf32, #tpu.memory_space<vmem>>, %arg3: memref<1x8x128xf32, #tpu.memory_space<vmem>>) attributes {dimension_semantics = [#tpu.dimension_semantics<parallel>], iteration_bounds = array<i64: 2>, scalar_prefetch = 0 : i64, scratch_operands = 0 : i64, tpu.core_type = #tpu.core_type<tc>, window_params = [{transform_indices = @transform_0, window_bounds = array<i64: 1, 3, 16, 16>}, {transform_indices = @transform_1, window_bounds = array<i64: 1, 3, 16, 16>}, {transform_indices = @transform_2, window_bounds = array<i64: 1, 8, 128>}]} {
    %c0 = arith.constant 0 : index
    %c0_0 = arith.constant 0 : index
    %c0_1 = arith.constant 0 : index
    %c0_2 = arith.constant 0 : index
    %0 = vector.load %arg1[%c0, %c0_0, %c0_1, %c0_2] : memref<1x3x16x16xf32, #tpu.memory_space<vmem>>, vector<1x3x16x16xf32>
    %1 = vector.shape_cast %0 : vector<1x3x16x16xf32> to vector<3x16x16xf32>
    %c0_3 = arith.constant 0 : index
    %c0_4 = arith.constant 0 : index
    %c0_5 = arith.constant 0 : index
    %c0_6 = arith.constant 0 : index
    %2 = vector.load %arg2[%c0_3, %c0_4, %c0_5, %c0_6] : memref<1x3x16x16xf32, #tpu.memory_space<vmem>>, vector<1x3x16x16xf32>
    %3 = vector.shape_cast %2 : vector<1x3x16x16xf32> to vector<3x16x16xf32>
    %4 = arith.subf %1, %3 : vector<3x16x16xf32>
    %5 = math.absf %4 : vector<3x16x16xf32>
    %6 = vector.shape_cast %5 : vector<3x16x16xf32> to vector<1x3x16x16xf32>
    %cst = arith.constant dense<0.000000e+00> : vector<1xf32>
    %7 = vector.multi_reduction <add>, %6, %cst [1, 2, 3] : vector<1x3x16x16xf32> to vector<1xf32>
    %8 = vector.shape_cast %7 : vector<1xf32> to vector<1x1x1x1xf32>
    %9 = vector.extract %8[0, 0, 0, 0] : f32 from vector<1x1x1x1xf32>
    %cst_7 = arith.constant 0.000000e+00 : f32
    %10 = vector.broadcast %cst_7 : f32 to vector<3x16x1xf32>
    %11 = vector.extract_strided_slice %1 {offsets = [0, 0, 1], sizes = [3, 16, 15], strides = [1, 1, 1]} : vector<3x16x16xf32> to vector<3x16x15xf32>
    %12 = tpu.concatenate %11, %10 in 2 : vector<3x16x15xf32>, vector<3x16x1xf32> -> vector<3x16x16xf32>
    %cst_8 = arith.constant 0.000000e+00 : f32
    %13 = vector.broadcast %cst_8 : f32 to vector<3x16x1xf32>
    %14 = vector.extract_strided_slice %1 {offsets = [0, 0, 0], sizes = [3, 16, 15], strides = [1, 1, 1]} : vector<3x16x16xf32> to vector<3x16x15xf32>
    %15 = tpu.concatenate %13, %14 in 2 : vector<3x16x1xf32>, vector<3x16x15xf32> -> vector<3x16x16xf32>
    %16 = arith.subf %12, %15 : vector<3x16x16xf32>
    %cst_9 = arith.constant 2.000000e+00 : f32
    %17 = vector.broadcast %cst_9 : f32 to vector<3x16x16xf32>
    %18 = arith.mulf %17, %1 : vector<3x16x16xf32>
    %19 = arith.addf %15, %18 : vector<3x16x16xf32>
    %20 = arith.addf %19, %12 : vector<3x16x16xf32>
    %cst_10 = arith.constant 0.000000e+00 : f32
    %21 = vector.broadcast %cst_10 : f32 to vector<3x1x16xf32>
    %22 = vector.extract_strided_slice %16 {offsets = [0, 0, 0], sizes = [3, 15, 16], strides = [1, 1, 1]} : vector<3x16x16xf32> to vector<3x15x16xf32>
    %23 = tpu.concatenate %21, %22 in 1 : vector<3x1x16xf32>, vector<3x15x16xf32> -> vector<3x16x16xf32>
    %cst_11 = arith.constant 0.000000e+00 : f32
    %24 = vector.broadcast %cst_11 : f32 to vector<3x1x16xf32>
    %25 = vector.extract_strided_slice %16 {offsets = [0, 1, 0], sizes = [3, 15, 16], strides = [1, 1, 1]} : vector<3x16x16xf32> to vector<3x15x16xf32>
    %26 = tpu.concatenate %25, %24 in 1 : vector<3x15x16xf32>, vector<3x1x16xf32> -> vector<3x16x16xf32>
    %cst_12 = arith.constant 0.000000e+00 : f32
    %27 = vector.broadcast %cst_12 : f32 to vector<3x1x16xf32>
    %28 = vector.extract_strided_slice %20 {offsets = [0, 0, 0], sizes = [3, 15, 16], strides = [1, 1, 1]} : vector<3x16x16xf32> to vector<3x15x16xf32>
    %29 = tpu.concatenate %27, %28 in 1 : vector<3x1x16xf32>, vector<3x15x16xf32> -> vector<3x16x16xf32>
    %cst_13 = arith.constant 0.000000e+00 : f32
    %30 = vector.broadcast %cst_13 : f32 to vector<3x1x16xf32>
    %31 = vector.extract_strided_slice %20 {offsets = [0, 1, 0], sizes = [3, 15, 16], strides = [1, 1, 1]} : vector<3x16x16xf32> to vector<3x15x16xf32>
    %32 = tpu.concatenate %31, %30 in 1 : vector<3x15x16xf32>, vector<3x1x16xf32> -> vector<3x16x16xf32>
    %cst_14 = arith.constant 2.000000e+00 : f32
    %33 = vector.broadcast %cst_14 : f32 to vector<3x16x16xf32>
    %34 = arith.mulf %33, %16 : vector<3x16x16xf32>
    %35 = arith.addf %23, %34 : vector<3x16x16xf32>
    %36 = arith.addf %35, %26 : vector<3x16x16xf32>
    %37 = arith.subf %29, %32 : vector<3x16x16xf32>
    %38 = math.absf %36 : vector<3x16x16xf32>
    %39 = math.absf %37 : vector<3x16x16xf32>
    %40 = arith.addf %38, %39 : vector<3x16x16xf32>
    %cst_15 = arith.constant 0.000000e+00 : f32
    %41 = vector.broadcast %cst_15 : f32 to vector<3x16x1xf32>
    %42 = vector.extract_strided_slice %3 {offsets = [0, 0, 1], sizes = [3, 16, 15], strides = [1, 1, 1]} : vector<3x16x16xf32> to vector<3x16x15xf32>
    %43 = tpu.concatenate %42, %41 in 2 : vector<3x16x15xf32>, vector<3x16x1xf32> -> vector<3x16x16xf32>
    %cst_16 = arith.constant 0.000000e+00 : f32
    %44 = vector.broadcast %cst_16 : f32 to vector<3x16x1xf32>
    %45 = vector.extract_strided_slice %3 {offsets = [0, 0, 0], sizes = [3, 16, 15], strides = [1, 1, 1]} : vector<3x16x16xf32> to vector<3x16x15xf32>
    %46 = tpu.concatenate %44, %45 in 2 : vector<3x16x1xf32>, vector<3x16x15xf32> -> vector<3x16x16xf32>
    %47 = arith.subf %43, %46 : vector<3x16x16xf32>
    %cst_17 = arith.constant 2.000000e+00 : f32
    %48 = vector.broadcast %cst_17 : f32 to vector<3x16x16xf32>
    %49 = arith.mulf %48, %3 : vector<3x16x16xf32>
    %50 = arith.addf %46, %49 : vector<3x16x16xf32>
    %51 = arith.addf %50, %43 : vector<3x16x16xf32>
    %cst_18 = arith.constant 0.000000e+00 : f32
    %52 = vector.broadcast %cst_18 : f32 to vector<3x1x16xf32>
    %53 = vector.extract_strided_slice %47 {offsets = [0, 0, 0], sizes = [3, 15, 16], strides = [1, 1, 1]} : vector<3x16x16xf32> to vector<3x15x16xf32>
    %54 = tpu.concatenate %52, %53 in 1 : vector<3x1x16xf32>, vector<3x15x16xf32> -> vector<3x16x16xf32>
    %cst_19 = arith.constant 0.000000e+00 : f32
    %55 = vector.broadcast %cst_19 : f32 to vector<3x1x16xf32>
    %56 = vector.extract_strided_slice %47 {offsets = [0, 1, 0], sizes = [3, 15, 16], strides = [1, 1, 1]} : vector<3x16x16xf32> to vector<3x15x16xf32>
    %57 = tpu.concatenate %56, %55 in 1 : vector<3x15x16xf32>, vector<3x1x16xf32> -> vector<3x16x16xf32>
    %cst_20 = arith.constant 0.000000e+00 : f32
    %58 = vector.broadcast %cst_20 : f32 to vector<3x1x16xf32>
    %59 = vector.extract_strided_slice %51 {offsets = [0, 0, 0], sizes = [3, 15, 16], strides = [1, 1, 1]} : vector<3x16x16xf32> to vector<3x15x16xf32>
    %60 = tpu.concatenate %58, %59 in 1 : vector<3x1x16xf32>, vector<3x15x16xf32> -> vector<3x16x16xf32>
    %cst_21 = arith.constant 0.000000e+00 : f32
    %61 = vector.broadcast %cst_21 : f32 to vector<3x1x16xf32>
    %62 = vector.extract_strided_slice %51 {offsets = [0, 1, 0], sizes = [3, 15, 16], strides = [1, 1, 1]} : vector<3x16x16xf32> to vector<3x15x16xf32>
    %63 = tpu.concatenate %62, %61 in 1 : vector<3x15x16xf32>, vector<3x1x16xf32> -> vector<3x16x16xf32>
    %cst_22 = arith.constant 2.000000e+00 : f32
    %64 = vector.broadcast %cst_22 : f32 to vector<3x16x16xf32>
    %65 = arith.mulf %64, %47 : vector<3x16x16xf32>
    %66 = arith.addf %54, %65 : vector<3x16x16xf32>
    %67 = arith.addf %66, %57 : vector<3x16x16xf32>
    %68 = arith.subf %60, %63 : vector<3x16x16xf32>
    %69 = math.absf %67 : vector<3x16x16xf32>
    %70 = math.absf %68 : vector<3x16x16xf32>
    %71 = arith.addf %69, %70 : vector<3x16x16xf32>
    %72 = arith.subf %40, %71 : vector<3x16x16xf32>
    %73 = math.absf %72 : vector<3x16x16xf32>
    %74 = vector.shape_cast %73 : vector<3x16x16xf32> to vector<1x3x16x16xf32>
    %cst_23 = arith.constant dense<0.000000e+00> : vector<1xf32>
    %75 = vector.multi_reduction <add>, %74, %cst_23 [1, 2, 3] : vector<1x3x16x16xf32> to vector<1xf32>
    %76 = vector.shape_cast %75 : vector<1xf32> to vector<1x1x1x1xf32>
    %77 = vector.extract %76[0, 0, 0, 0] : f32 from vector<1x1x1x1xf32>
    %78 = tpu.iota {dimensions = array<i32: 0>} : vector<8x128xi32>
    %79 = tpu.iota {dimensions = array<i32: 1>} : vector<8x128xi32>
    %c0_i32 = arith.constant 0 : i32
    %80 = vector.broadcast %c0_i32 : i32 to vector<8x128xi32>
    %81 = arith.cmpi eq, %78, %80 : vector<8x128xi32>
    %c0_i32_24 = arith.constant 0 : i32
    %82 = vector.broadcast %c0_i32_24 : i32 to vector<8x128xi32>
    %83 = arith.cmpi eq, %79, %82 : vector<8x128xi32>
    %84 = arith.andi %81, %83 : vector<8x128xi1>
    %cst_25 = arith.constant 0.000000e+00 : f32
    %85 = vector.broadcast %9 : f32 to vector<8x128xf32>
    %86 = vector.broadcast %cst_25 : f32 to vector<8x128xf32>
    %87 = arith.select %84, %85, %86 : vector<8x128xi1>, vector<8x128xf32>
    %c0_i32_26 = arith.constant 0 : i32
    %88 = vector.broadcast %c0_i32_26 : i32 to vector<8x128xi32>
    %89 = arith.cmpi eq, %78, %88 : vector<8x128xi32>
    %c1_i32 = arith.constant 1 : i32
    %90 = vector.broadcast %c1_i32 : i32 to vector<8x128xi32>
    %91 = arith.cmpi eq, %79, %90 : vector<8x128xi32>
    %92 = arith.andi %89, %91 : vector<8x128xi1>
    %cst_27 = arith.constant 0.000000e+00 : f32
    %93 = vector.broadcast %77 : f32 to vector<8x128xf32>
    %94 = vector.broadcast %cst_27 : f32 to vector<8x128xf32>
    %95 = arith.select %92, %93, %94 : vector<8x128xi1>, vector<8x128xf32>
    %96 = arith.addf %87, %95 : vector<8x128xf32>
    %c0_28 = arith.constant 0 : index
    %c0_29 = arith.constant 0 : index
    %c0_30 = arith.constant 0 : index
    %97 = vector.load %arg3[%c0_28, %c0_29, %c0_30] : memref<1x8x128xf32, #tpu.memory_space<vmem>>, vector<1x8x128xf32>
    %98 = vector.shape_cast %97 : vector<1x8x128xf32> to vector<8x128xf32>
    %99 = vector.shape_cast %96 : vector<8x128xf32> to vector<1x8x128xf32>
    tpu.vector_store %arg3[%c0_28, %c0_29, %c0_30], %99 {strides = array<i32>} : memref<1x8x128xf32, #tpu.memory_space<vmem>>, vector<1x8x128xf32>,
    return
  }
  func.func @transform_0(%arg0: i32) -> (i32, i32, i32, i32) {
    %c0_i32 = arith.constant 0 : i32
    %c0_i32_0 = arith.constant 0 : i32
    %c0_i32_1 = arith.constant 0 : i32
    %c0_i32_2 = arith.constant 0 : i32
    return %arg0, %c0_i32, %c0_i32_0, %c0_i32_1 : i32, i32, i32, i32
  }
  func.func @transform_1(%arg0: i32) -> (i32, i32, i32, i32) {
    %c0_i32 = arith.constant 0 : i32
    %c0_i32_0 = arith.constant 0 : i32
    %c0_i32_1 = arith.constant 0 : i32
    %c0_i32_2 = arith.constant 0 : i32
    return %arg0, %c0_i32, %c0_i32_0, %c0_i32_1 : i32, i32, i32, i32
  }
  func.func @transform_2(%arg0: i32) -> (i32, i32, i32) {
    %c0_i32 = arith.constant 0 : i32
    %c0_i32_0 = arith.constant 0 : i32
    %c0_i32_1 = arith.constant 0 : i32
    return %arg0, %c0_i32, %c0_i32_0 : i32, i32, i32
  }
}

</mosaic_0001>

<bundles_post_ra>
// kernel: content_loss.1
= control target key start
LH: loop header
LB: loop body
LE: loop exit
PB: predicated region body
PF: predicated region fallthrough
CT: control target
= control target key end

     0   :  { %7 = vsyncpa [#allocation3], 0  ;;  %s1430_s0 = inlined_call_operand.hbm [shape: f32[2,3,16,16], index: 0, kind: input, shape index: {}]   ;;  %s1431_s1 = inlined_call_operand.hbm [shape: f32[2,3,16,16], index: 1, kind: input, shape index: {}]   ;;  %s1432_s2 = inlined_call_operand.vmem [shape: f32[2,8,128], index: 2, kind: output, shape index: {}]  }
   0x1   :  { %9 = vsyncpa [#allocation3 + $0x1], 0 }
   0x2   :  { %10 = vsyncpa [#allocation5], 0 }
   0x3   :  { %12 = vsyncpa [#allocation5 + $0x1], 0  ;;  %s981_s9 = smov 0   ;;  %s983_s10 = smov 0  }
   0x4   :  { %s985_s11 = smov 0   ;;  %s987_s12 = smov 0  }
   0x5 LB: > { %s1000_s13 = sadd.s32 4294967295, %s958_s12   ;;  %s1003_s14 = sadd.s32 1, %s958_s12   ;;  %s958_s12 = sphi %s987_s12, %s1442_s12   ;;  %s954_s11 = sphi %s985_s11, %s1441_s11   ;;  %s950_s10 = sphi %s983_s10, %s1440_s10   ;;  %s946_s9 = sphi %s981_s9, %s1439_s9  }
   0x6   : > { %s22_s15 = ssub.s32 %s958_s12, %s1003_s14  ;;  %s25_s16 = sadd.s32 1, %s954_s11 }
   0x7   : > { %p23_p0 = scmp.eq.s32.totalorder %s22_s15, 0  ;;  %p32_p1 = scmp.ne.s32.totalorder %s954_s11, %s950_s10 }
   0x8   : > { %p33_p2 = scmp.eq.s32.totalorder %s958_s12, 0  ;;  %p38_p3 = scmp.ne.s32.totalorder %s950_s10, %s946_s9 }
   0x9   : > { %s1013_s17 = scalar_select %p23_p0, %s954_s11, %s25_s16  }
   0xa   : > { %p34_p4 = por %p33_p2, %p32_p1  ;;  %p39_p5 = scmp.eq.s32.totalorder %s1000_s13, 0 }
   0xb   : > { %p823_p6 = scmp.lt.s32.totalorder %s958_s12, 2  ;;  %s1022_s19 = sand.u32 1, %s954_s11  }
   0xc   : > { %p1017_p7 = por %p39_p5, %p38_p3  ;;  %s803_s20 = smul.u32 48, %s1022_s19 }
   0xd   : > { %s804_s21 = smul.u32 768, %s958_s12  ;;  %p1026_p8 = pnand %p823_p6, %p34_p4 }
   0xe   : > { %s1434_s18 = scalar_select %p1017_p7, 1, 0 }
   0xf   : > { %s1035_s25 = scalar_lea.hbm %s1430_s0, %s804_s21  ;;  %s118_s26 = scalar_lea.vmem [#allocation2], %s803_s20 }
  0x10   : > { %s125_s27 = sshll.u32 %s118_s26, 4  ;;  %s115_s28 = scalar_lea.sflag [#allocation3], %s1022_s19  ;;  %s1039_s27 = int_to_ptr.vmem [resolvable:$true] %s125_s27 }
  0x11   : > { %s860_s29 = scalar_lea.hbm %s1035_s25, 768  ;;  %p862_p11 = pneg %p1026_p8 }
  0x12   : > { %p861_p10 = scmp.ne.s32.totalorder %s1035_s25, %s860_s29  ;;  %s865_s4 = scalar_lea.hbm %s1430_s0, 1536 }
  0x13   : > { %p866_p0 = scmp.lt.u32.totalorder %s1035_s25, %s1430_s0  ;;  %p867_p1 = scmp.lt.u32.totalorder %s865_s4, %s860_s29 }
  0x14   : > { %p863_p12 = pnand %p862_p11, %p861_p10  ;;  %p869_p3 = scmp.lt.u32.totalorder %s860_s29, %s1035_s25 }
  0x15   : > { %p868_p2 = por %p867_p1, %p866_p0 }
  0x16   : > { %p864_p13 = pneg %p863_p12 }
  0x17   : > { %p870_p4 = por %p869_p3, %p868_p2 }
  0x19   : > { %p871_p5 = pnand %p870_p4, %p864_p13 }
  0x1b   : > { %874 = shalt.err (!%p871_p5)
}
  0x1c   : > { %s875_s7 = scalar_lea.vmem %s1039_s27, 768  ;;  %s960_s8 = smov [#allocation2]  }
  0x1d   : > { %p876_p6 = scmp.ne.s32.totalorder %s1039_s27, %s875_s7  ;;  %s880_s9 = sshll.u32 %s960_s8, 4  ;;  %s881_s9 = int_to_ptr.vmem [resolvable:$false] %s880_s9 }
  0x1e   : > { %s882_s15 = scalar_lea.vmem %s881_s9, 1536  ;;  %p883_p9 = scmp.lt.s32.totalorder %s1039_s27, %s881_s9 }
  0x1f   : > { %p878_p10 = pnand %p876_p6, %p862_p11  ;;  %p884_p0 = scmp.lt.s32.totalorder %s882_s15, %s875_s7 }
  0x21   : > { %p879_p12 = pneg %p878_p10  ;;  %p885_p1 = por %p884_p0, %p883_p9 }
  0x23   : > { %p886_p2 = pnand %p885_p1, %p879_p12 }
  0x25   : > { %889 = shalt.err (!%p886_p2)
}
  0x26   : > { %s961_s16 = smov 128   ;;  %s962_s23 = smov 8  }
  0x27   : > { %819 = dma.hbm_to_vmem [thread:$0]  (!%p1026_p8), %s1035_s25, 768, %s1039_s27, %s115_s28, %s961_s16, %s961_s16, %s962_s23  }
  0x28   : > { %p154_p9 = scmp.lt.s32.totalorder %s958_s12, 3  ;;  %s1079_s29 = scalar_lea.hbm %s1431_s1, %s804_s21 }
  0x29   : > { %p1436_p13 = scmp.ge.s32.totalorder %s958_s12, 1  ;;  %s139_s3 = scalar_lea.vmem [#allocation4], %s803_s20 }
  0x2a   : > { %s146_s4 = sshll.u32 %s139_s3, 4  ;;  %s136_s25 = scalar_lea.sflag [#allocation5], %s1022_s19  ;;  %s1089_s4 = int_to_ptr.vmem [resolvable:$true] %s146_s4 }
  0x2b   : > { %p1083_p3 = pnand %p1436_p13, %p154_p9  ;;  %s890_s27 = scalar_lea.hbm %s1079_s29, 768 }
  0x2c   : > { %p891_p4 = scmp.ne.s32.totalorder %s1079_s29, %s890_s27  ;;  %s895_s28 = scalar_lea.hbm %s1431_s1, 1536 }
  0x2d   : > { %p896_p10 = scmp.lt.u32.totalorder %s1079_s29, %s1431_s1  ;;  %p897_p12 = scmp.lt.u32.totalorder %s895_s28, %s890_s27 }
  0x2e   : > { %p893_p5 = pnand %p891_p4, %p862_p11  ;;  %p899_p1 = scmp.lt.u32.totalorder %s890_s27, %s1079_s29 }
  0x2f   : > { %p898_p0 = por %p897_p12, %p896_p10 }
  0x30   : > { %p894_p6 = pneg %p893_p5 }
  0x31   : > { %p900_p2 = por %p899_p1, %p898_p0 }
  0x33   : > { %p901_p9 = pnand %p900_p2, %p894_p6 }
  0x35   : > { %904 = shalt.err (!%p901_p9)
}
  0x36   : > { %s905_s20 = scalar_lea.vmem %s1089_s4, 768  ;;  %s963_s7 = smov [#allocation4]  }
  0x37   : > { %p906_p13 = scmp.ne.s32.totalorder %s1089_s4, %s905_s20  ;;  %s910_s8 = sshll.u32 %s963_s7, 4  ;;  %s911_s8 = int_to_ptr.vmem [resolvable:$false] %s910_s8 }
  0x38   : > { %s912_s9 = scalar_lea.vmem %s911_s8, 1536  ;;  %p913_p7 = scmp.lt.s32.totalorder %s1089_s4, %s911_s8 }
  0x39   : > { %p908_p4 = pnand %p906_p13, %p862_p11  ;;  %p914_p10 = scmp.lt.s32.totalorder %s912_s9, %s905_s20 }
  0x3b   : > { %p909_p5 = pneg %p908_p4  ;;  %p915_p12 = por %p914_p10, %p913_p7 }
  0x3d   : > { %p916_p0 = pnand %p915_p12, %p909_p5 }
  0x3f   : > { %919 = shalt.err (!%p916_p0)
}
  0x40   : > { %822 = dma.hbm_to_vmem [thread:$0]  (!%p1026_p8), %s1079_s29, 768, %s1089_s4, %s136_s25, %s961_s16, %s961_s16, %s962_s23  }
  0x41   : > { %158 = sbr.rel (%p1083_p3) target bundleno = 476 (0x1dc), region = 28  ;;  %s160_s15 = sand.u32 (!%p1083_p3), 1, %s950_s10  }
  0x42   : > { %s807_s24 = smul.u32 (!%p1083_p3), 48, %s160_s15  ;;  %s161_s26 = scalar_lea.sflag (!%p1083_p3), [#allocation3], %s160_s15 }
  0x43   : > { %p1438_p7 = scmp.ne.s32.totalorder (!%p1083_p3), %s1434_s18, 0 }
  0x44   : > { %s1123_s3 = scalar_lea.vmem (!%p1083_p3), [#allocation2], %s807_s24 }
  0x48   : > { %937 = dma.done.wait (%p1438_p7), %s161_s26, 768  }
  0x49   : > { %939 = vsyncadd (%p1438_p7), %s161_s26, 4294966528  ;;  %s170_s19 = scalar_lea.sflag [#allocation5], %s160_s15  ;;  %s1129_s22 = scalar_lea.vmem [#allocation4], %s807_s24 }
  0x4a   : > { %941 = dma.done.wait (%p1438_p7), %s170_s19, 768  }
  0x4b   : > { %943 = vsyncadd (%p1438_p7), %s170_s19, 4294966528  ;;  %v1136_v0 = vld [vmem:[%s1123_s3] sm:$0xff]  ;;  %s964_s16 = smov 1   ;;  %s965_s23 = smov 127   ;;  %v1143_v1 = vld [vmem:[%s1123_s3 + $0x8] sm:$0xff]  ;;  %vm226_vm0 = vcmask 130048  }
  0x4c   : > { %278 = vrot.lane.b32.xlu1 %v1136_v0, %s964_s16  ;;  %253 = vrot.lane.b32.xlu0 %v1136_v0, %s965_s23  ;;  %v1150_v2 = vld [vmem:[%s1129_s22 + $0x8] sm:$0xff]  ;;  %v1153_v3 = vld [vmem:[%s1129_s22] sm:$0xff]  ;;  %vm296_vm1 = vcmask 7168   ;;  %v309_v35 = vmul.f32 2.0, %v1136_v0  ;;  %vm271_vm2 = vcmask 121856   ;;  %v310_v42 = vmul.f32 2.0, %v1143_v1 }
  0x4d   : > { %v1164_v4 = vld [vmem:[%s1123_s3 + $0x10] sm:$0xff]  ;;  %v1174_v6 = vld [vmem:[%s1123_s3 + $0x18] sm:$0xff]  ;;  %v1192_v8 = vld [vmem:[%s1123_s3 + $0x20] sm:$0xff]  ;;  %v215_v12 = vsub.f32 %v1143_v1, %v1150_v2  ;;  %v214_v13 = vsub.f32 %v1136_v0, %v1153_v3  ;;  %vm333_vm3 = vcmask 1040384   ;;  %vm352_vm4 = vcmask 1046528   ;;  %p198_p8 = scmp.lt.s32.totalorder %s1000_s13, 1 }
  0x4e   : > { %v1171_v5 = vld [vmem:[%s1129_s22 + $0x10] sm:$0xff]  ;;  %v1181_v7 = vld [vmem:[%s1129_s22 + $0x18] sm:$0xff]  ;;  %v1199_v9 = vld [vmem:[%s1129_s22 + $0x20] sm:$0xff]  ;;  %v516_v47 = vmul.f32 2.0, %v1150_v2  ;;  %v515_v48 = vmul.f32 2.0, %v1153_v3  ;;  %v1246_v52 = vmul.f32 2.0, %v1164_v4 }
  0x4f   : > { %v1202_v10 = vld [vmem:[%s1123_s3 + $0x28] sm:$0xff]  ;;  %v221_v14 = vand.u32 2147483647, %v215_v12  ;;  %v220_v15 = vand.u32 2147483647, %v214_v13  ;;  %v216_v16 = vsub.f32 %v1164_v4, %v1171_v5  ;;  %v217_v20 = vsub.f32 %v1174_v6, %v1181_v7  ;;  %s1444_s13 = smov (!%p198_p8, %s1000_s13), 1 }
  0x50   : > { %280 = vrot.lane.b32.xlu1 %v1143_v1, %s964_s16  ;;  %255 = vrot.lane.b32.xlu0 %v1143_v1, %s965_s23  ;;  %v1209_v11 = vld [vmem:[%s1129_s22 + $0x28] sm:$0xff]  ;;  %v218_v23 = vsub.f32 %v1192_v8, %v1199_v9  ;;  %v1250_v56 = vmul.f32 2.0, %v1174_v6  ;;  %v1253_v58 = vmul.f32 2.0, %v1181_v7  ;;  %v1256_v59 = vmul.f32 2.0, %v1171_v5  ;;  %s800_s29 = sshll.u32 %s1444_s13, 3 }
  0x51   : > { %v228_v17 = vsel %vm226_vm0, %v221_v14, 0.0  ;;  %v227_v18 = vsel %vm226_vm0, %v220_v15, 0.0  ;;  %v222_v19 = vand.u32 2147483647, %v216_v16  ;;  %v223_v22 = vand.u32 2147483647, %v217_v20  ;;  %s201_s27 = scalar_lea.vmem %s1432_s2, %s800_s29 }
  0x52   : > { %v229_v21 = vadd.f32 %v228_v17, %v227_v18  ;;  %v219_v26 = vsub.f32 %v1202_v10, %v1209_v11  ;;  %v224_v27 = vand.u32 2147483647, %v218_v23  ;;  %v1259_v60 = vmul.f32 2.0, %v1192_v8 }
  0x53   : > { %v230_v24 = vsel %vm226_vm0, %v222_v19, 0.0  ;;  %v232_v28 = vsel %vm226_vm0, %v223_v22, 0.0 }
  0x54   : > { %463 = vrot.lane.b32.xlu1 %v1150_v2, %s965_s23  ;;  %461 = vrot.lane.b32.xlu0 %v1153_v3, %s965_s23  ;;  %v231_v25 = vadd.f32 %v230_v24, %v229_v21  ;;  %v225_v30 = vand.u32 2147483647, %v219_v26  ;;  %v234_v31 = vsel %vm226_vm0, %v224_v27, 0.0 }
  0x56   : > { %v233_v29 = vadd.f32 %v232_v28, %v231_v25  ;;  %v236_v33 = vsel %vm226_vm0, %v225_v30, 0.0 }
  0x58   : > { %487 = vrot.lane.b32.xlu1 %v1150_v2, %s964_s16  ;;  %485 = vrot.lane.b32.xlu0 %v1153_v3, %s964_s16  ;;  %v235_v32 = vadd.f32 %v234_v31, %v233_v29  ;;  %v1262_v2 = vmul.f32 2.0, %v1202_v10 }
  0x5a   : > { %v237_v34 = vadd.f32 %v236_v33, %v235_v32  ;;  %v1276_v33 = vmul.f32 2.0, %v1209_v11 }
  0x5c   : > { %282 = vrot.lane.b32.xlu1 %v1164_v4, %s964_s16  ;;  %257 = vrot.lane.b32.xlu0 %v1164_v4, %s965_s23 }
  0x60   : > { %465 = vrot.lane.b32.xlu1 %v1171_v5, %s965_s23  ;;  %284 = vrot.lane.b32.xlu0 %v1174_v6, %s964_s16 }
  0x64   : > { %491 = vrot.lane.b32.xlu1 %v1181_v7, %s964_s16  ;;  %489 = vrot.lane.b32.xlu0 %v1171_v5, %s964_s16 }
  0x68   : > { %467 = vrot.lane.b32.xlu1 %v1181_v7, %s965_s23  ;;  %259 = vrot.lane.b32.xlu0 %v1174_v6, %s965_s23 }
  0x6c   : > { %286 = vrot.lane.b32.xlu1 %v1192_v8, %s964_s16  ;;  %261 = vrot.lane.b32.xlu0 %v1192_v8, %s965_s23 }
  0x70   : > { %469 = vrot.lane.b32.xlu1 %v1199_v9, %s965_s23  ;;  %288 = vrot.lane.b32.xlu0 %v1202_v10, %s964_s16 }
  0x74   : > { %495 = vrot.lane.b32.xlu1 %v1209_v11, %s964_s16  ;;  %493 = vrot.lane.b32.xlu0 %v1199_v9, %s964_s16 }
  0x78   : > { %471 = vrot.lane.b32.xlu1 %v1209_v11, %s965_s23  ;;  %263 = vrot.lane.b32.xlu0 %v1202_v10, %s965_s23 }
  0x97   : > { %238 = vadd.xlane.f32.xlu0 %v237_v34  ;;  %v1279_v34 = vmul.f32 2.0, %v1199_v9 }
  0xbe   : > { %v279_v36 = vpop.permute.xlu1 %278  ;;  %v254_v37 = vpop.permute.xlu0 %253 }
  0xbf   : > { %v297_v38 = vsel %vm296_vm1, 0.0, %v279_v36  ;;  %v272_v39 = vsel %vm271_vm2, %v254_v37, 0.0 }
  0xc0   : > { %v315_v40 = vadd.f32 %v309_v35, %v297_v38  ;;  %v303_v41 = vsub.f32 %v272_v39, %v297_v38 }
  0xc2   : > { %v321_v43 = vadd.f32 %v315_v40, %v272_v39  ;;  %v334_v44 = vrot.slane %v303_v41, 7  ;;  %v281_v45 = vpop.permute.xlu1 %280  ;;  %v256_v46 = vpop.permute.xlu0 %255  ;;  %v413_v49 = vmul.f32 2.0, %v303_v41  ;;  %v353_v61 = vrot.slane %v303_v41, 1 }
  0xc3   : > { %v298_v50 = vsel %vm296_vm1, 0.0, %v281_v45  ;;  %v273_v51 = vsel %vm271_vm2, %v256_v46, 0.0 }
  0xc4   : > { %v349_v53 = vsel %vm333_vm3, 0.0, %v334_v44  ;;  %v377_v54 = vrot.slane %v321_v43, 7  ;;  %v316_v55 = vadd.f32 %v310_v42, %v298_v50  ;;  %v304_v57 = vsub.f32 %v273_v51, %v298_v50 }
  0xc5   : > { %v395_v62 = vrot.slane %v321_v43, 1  ;;  %v419_v3 = vadd.f32 %v413_v49, %v349_v53 }
  0xc6   : > { %v322_v63 = vadd.f32 %v316_v55, %v273_v51  ;;  %v464_v0 = vpop.permute.xlu1 %463  ;;  %v462_v1 = vpop.permute.xlu0 %461  ;;  %v335_v4 = vrot.slane %v304_v57, 7  ;;  %v354_v6 = vrot.slane %v304_v57, 1  ;;  %v414_v12 = vmul.f32 2.0, %v304_v57 }
  0xc7   : > { %v392_v7 = vsel %vm333_vm3, 0.0, %v377_v54  ;;  %v480_v14 = vsel %vm271_vm2, %v464_v0, 0.0  ;;  %v479_v17 = vsel %vm271_vm2, %v462_v1, 0.0 }
  0xc8   : > { %v378_v13 = vrot.slane %v322_v63, 7  ;;  %v396_v5 = vrot.slane %v322_v63, 1  ;;  %v336_v8 = vsel %vm333_vm3, %v334_v44, %v335_v4  ;;  %v355_v15 = vsel %vm352_vm4, %v353_v61, %v354_v6 }
  0xc9   : > { %v368_v16 = vsel %vm352_vm4, %v354_v6, 0.0  ;;  %v420_v20 = vadd.f32 %v414_v12, %v336_v8  ;;  %v425_v23 = vadd.f32 %v419_v3, %v355_v15 }
  0xca   : > { %v379_v10 = vsel %vm333_vm3, %v377_v54, %v378_v13  ;;  %v397_v18 = vsel %vm352_vm4, %v395_v62, %v396_v5  ;;  %v410_v19 = vsel %vm352_vm4, %v396_v5, 0.0  ;;  %v488_v21 = vpop.permute.xlu1 %487  ;;  %v486_v22 = vpop.permute.xlu0 %485 }
  0xcb   : > { %v431_v24 = vsub.f32 %v392_v7, %v397_v18  ;;  %v432_v25 = vsub.f32 %v379_v10, %v410_v19  ;;  %v504_v26 = vsel %vm296_vm1, 0.0, %v488_v21  ;;  %v426_v27 = vadd.f32 %v420_v20, %v368_v16 }
  0xcc   : > { %v510_v28 = vsub.f32 %v480_v14, %v504_v26  ;;  %v522_v29 = vadd.f32 %v516_v47, %v504_v26  ;;  %v503_v30 = vsel %vm296_vm1, 0.0, %v486_v22  ;;  %v437_v35 = vand.u32 2147483647, %v425_v23 }
  0xcd   : > { %v443_v31 = vand.u32 2147483647, %v431_v24  ;;  %v509_v32 = vsub.f32 %v479_v17, %v503_v30  ;;  %v444_v41 = vand.u32 2147483647, %v432_v25  ;;  %v521_v43 = vadd.f32 %v515_v48, %v503_v30 }
  0xce   : > { %v528_v36 = vadd.f32 %v522_v29, %v480_v14  ;;  %v540_v37 = vrot.slane %v510_v28, 7  ;;  %v558_v38 = vrot.slane %v510_v28, 1  ;;  %v283_v39 = vpop.permute.xlu1 %282  ;;  %v258_v40 = vpop.permute.xlu0 %257  ;;  %v618_v42 = vmul.f32 2.0, %v510_v28 }
  0xcf   : > { %v539_v44 = vrot.slane %v509_v32, 7  ;;  %v438_v45 = vand.u32 2147483647, %v426_v27  ;;  %v1281_v46 = vadd.f32 %v443_v31, %v437_v35  ;;  %v527_v11 = vadd.f32 %v521_v43, %v479_v17 }
  0xd0   : > { %v582_v47 = vrot.slane %v528_v36, 7  ;;  %v600_v49 = vrot.slane %v528_v36, 1  ;;  %v557_v51 = vrot.slane %v509_v32, 1  ;;  %v572_v53 = vsel %vm352_vm4, %v558_v38, 0.0 }
  0xd1   : > { %v541_v50 = vsel %vm333_vm3, %v539_v44, %v540_v37  ;;  %v554_v9 = vsel %vm333_vm3, 0.0, %v539_v44  ;;  %v617_v54 = vmul.f32 2.0, %v509_v32  ;;  %v299_v57 = vsel %vm296_vm1, 0.0, %v283_v39 }
  0xd2   : > { %v624_v55 = vadd.f32 %v618_v42, %v541_v50  ;;  %v466_v61 = vpop.permute.xlu1 %465  ;;  %v285_v48 = vpop.permute.xlu0 %284  ;;  %v614_v62 = vsel %vm352_vm4, %v600_v49, 0.0  ;;  %v581_v63 = vrot.slane %v527_v11, 7  ;;  %v599_v0 = vrot.slane %v527_v11, 1 }
  0xd3   : > { %v317_v1 = vadd.f32 %v1246_v52, %v299_v57  ;;  %v559_v3 = vsel %vm352_vm4, %v557_v51, %v558_v38  ;;  %v623_v4 = vadd.f32 %v617_v54, %v554_v9  ;;  %v274_v12 = vsel %vm271_vm2, %v258_v40, 0.0 }
  0xd4   : > { %v630_v6 = vadd.f32 %v624_v55, %v572_v53  ;;  %v583_v7 = vsel %vm333_vm3, %v581_v63, %v582_v47  ;;  %v596_v13 = vsel %vm333_vm3, 0.0, %v581_v63  ;;  %v601_v5 = vsel %vm352_vm4, %v599_v0, %v600_v49 }
  0xd5   : > { %v1294_v14 = vsub.f32 %v274_v12, %v299_v57  ;;  %v629_v8 = vadd.f32 %v623_v4, %v559_v3  ;;  %v635_v15 = vsub.f32 %v596_v13, %v601_v5  ;;  %v636_v16 = vsub.f32 %v583_v7, %v614_v62 }
  0xd6   : > { %v642_v17 = vand.u32 2147483647, %v630_v6  ;;  %v492_v10 = vpop.permute.xlu1 %491  ;;  %v490_v52 = vpop.permute.xlu0 %489  ;;  %v1296_v18 = vadd.f32 %v317_v1, %v274_v12  ;;  %v481_v21 = vsel %vm271_vm2, %v466_v61, 0.0  ;;  %v1301_v22 = vadd.f32 %v444_v41, %v438_v45 }
  0xd7   : > { %v337_v19 = vrot.slane %v1294_v14, 7  ;;  %v415_v20 = vmul.f32 2.0, %v1294_v14  ;;  %v641_v23 = vand.u32 2147483647, %v629_v8  ;;  %v647_v24 = vand.u32 2147483647, %v635_v15 }
  0xd8   : > { %v648_v25 = vand.u32 2147483647, %v636_v16  ;;  %v356_v27 = vrot.slane %v1294_v14, 1  ;;  %v380_v28 = vrot.slane %v1296_v18, 7  ;;  %v300_v29 = vsel %vm296_vm1, 0.0, %v285_v48 }
  0xd9   : > { %v350_v26 = vsel %vm333_vm3, 0.0, %v337_v19  ;;  %v1309_v30 = vadd.f32 %v647_v24, %v641_v23  ;;  %v398_v32 = vrot.slane %v1296_v18, 1  ;;  %v318_v38 = vadd.f32 %v1250_v56, %v300_v29 }
  0xda   : > { %v1311_v31 = vadd.f32 %v648_v25, %v642_v17  ;;  %v421_v35 = vadd.f32 %v415_v20, %v350_v26  ;;  %v468_v36 = vpop.permute.xlu1 %467  ;;  %v260_v37 = vpop.permute.xlu0 %259  ;;  %v506_v39 = vsel %vm296_vm1, 0.0, %v492_v10  ;;  %v505_v40 = vsel %vm296_vm1, 0.0, %v490_v52 }
  0xdb   : > { %v482_v41 = vsel %vm271_vm2, %v468_v36, 0.0  ;;  %v1321_v42 = vsel %vm333_vm3, 0.0, %v380_v28  ;;  %v511_v43 = vsub.f32 %v481_v21, %v505_v40  ;;  %v523_v44 = vadd.f32 %v1256_v59, %v505_v40 }
  0xdc   : > { %v512_v45 = vsub.f32 %v482_v41, %v506_v39  ;;  %v524_v47 = vadd.f32 %v1253_v58, %v506_v39  ;;  %v275_v49 = vsel %vm271_vm2, %v260_v37, 0.0  ;;  %v659_v56 = vsub.f32 %v1281_v46, %v1309_v30 }
  0xdd   : > { %v660_v11 = vsub.f32 %v1301_v22, %v1311_v31  ;;  %v529_v50 = vadd.f32 %v523_v44, %v481_v21  ;;  %v542_v9 = vrot.slane %v511_v43, 7  ;;  %v560_v51 = vrot.slane %v511_v43, 1 }
  0xde   : > { %v619_v53 = vmul.f32 2.0, %v511_v43  ;;  %v287_v54 = vpop.permute.xlu1 %286  ;;  %v262_v55 = vpop.permute.xlu0 %261  ;;  %v530_v57 = vadd.f32 %v524_v47, %v482_v41  ;;  %v543_v61 = vrot.slane %v512_v45, 7  ;;  %v561_v59 = vrot.slane %v512_v45, 1 }
  0xdf   : > { %v620_v48 = vmul.f32 2.0, %v512_v45  ;;  %v555_v58 = vsel %vm333_vm3, 0.0, %v542_v9  ;;  %v584_v62 = vrot.slane %v529_v50, 7  ;;  %v602_v63 = vrot.slane %v529_v50, 1 }
  0xe0   : > { %v306_v0 = vsub.f32 %v275_v49, %v300_v29  ;;  %v625_v1 = vadd.f32 %v619_v53, %v555_v58  ;;  %v544_v3 = vsel %vm333_vm3, %v542_v9, %v543_v61  ;;  %v562_v4 = vsel %vm352_vm4, %v560_v51, %v561_v59 }
  0xe1   : > { %v573_v6 = vsel %vm352_vm4, %v561_v59, 0.0  ;;  %v597_v12 = vsel %vm333_vm3, 0.0, %v584_v62  ;;  %v585_v7 = vrot.slane %v530_v57, 7  ;;  %v603_v13 = vrot.slane %v530_v57, 1 }
  0xe2   : > { %v626_v5 = vadd.f32 %v620_v48, %v544_v3  ;;  %v470_v8 = vpop.permute.xlu1 %469  ;;  %v289_v15 = vpop.permute.xlu0 %288  ;;  %v631_v16 = vadd.f32 %v625_v1, %v562_v4  ;;  %v324_v17 = vadd.f32 %v318_v38, %v275_v49  ;;  %v338_v10 = vrot.slane %v306_v0, 7 }
  0xe3   : > { %v357_v52 = vrot.slane %v306_v0, 1  ;;  %v586_v20 = vsel %vm333_vm3, %v584_v62, %v585_v7  ;;  %v604_v21 = vsel %vm352_vm4, %v602_v63, %v603_v13  ;;  %v615_v23 = vsel %vm352_vm4, %v603_v13, 0.0 }
  0xe4   : > { %v632_v24 = vadd.f32 %v626_v5, %v573_v6  ;;  %v637_v25 = vsub.f32 %v597_v12, %v604_v21  ;;  %v638_v26 = vsub.f32 %v586_v20, %v615_v23  ;;  %v643_v29 = vand.u32 2147483647, %v631_v16 }
  0xe5   : > { %v339_v36 = vsel %vm333_vm3, %v337_v19, %v338_v10  ;;  %v358_v39 = vsel %vm352_vm4, %v356_v27, %v357_v52  ;;  %v369_v38 = vsel %vm352_vm4, %v357_v52, 0.0  ;;  %v381_v40 = vrot.slane %v324_v17, 7 }
  0xe6   : > { %v644_v37 = vand.u32 2147483647, %v632_v24  ;;  %v649_v41 = vand.u32 2147483647, %v637_v25  ;;  %v650_v43 = vand.u32 2147483647, %v638_v26  ;;  %v427_v49 = vadd.f32 %v421_v35, %v358_v39  ;;  %v496_v19 = vpop.permute.xlu1 %495  ;;  %v494_v9 = vpop.permute.xlu0 %493 }
  0xe7   : > { %v399_v44 = vrot.slane %v324_v17, 1  ;;  %v416_v45 = vmul.f32 2.0, %v306_v0  ;;  %v382_v47 = vsel %vm333_vm3, %v380_v28, %v381_v40  ;;  %v301_v50 = vsel %vm296_vm1, 0.0, %v287_v54 }
  0xe8   : > { %v276_v14 = vsel %vm271_vm2, %v262_v55, 0.0  ;;  %v1348_v51 = vadd.f32 %v649_v41, %v643_v29  ;;  %v1350_v27 = vadd.f32 %v650_v43, %v644_v37  ;;  %v439_v59 = vand.u32 2147483647, %v427_v49 }
  0xe9   : > { %v400_v53 = vsel %vm352_vm4, %v398_v32, %v399_v44  ;;  %v411_v57 = vsel %vm352_vm4, %v399_v44, 0.0  ;;  %v422_v61 = vadd.f32 %v416_v45, %v339_v36  ;;  %v319_v54 = vadd.f32 %v1259_v60, %v301_v50 }
  0xea   : > { %v433_v28 = vsub.f32 %v1321_v42, %v400_v53  ;;  %v434_v35 = vsub.f32 %v382_v47, %v411_v57  ;;  %v1358_v55 = vsub.f32 %v276_v14, %v301_v50  ;;  %v483_v48 = vsel %vm271_vm2, %v470_v8, 0.0  ;;  %v472_v7 = vpop.permute.xlu1 %471  ;;  %v264_v13 = vpop.permute.xlu0 %263 }
  0xeb   : > { %v302_v58 = vsel %vm296_vm1, 0.0, %v289_v15  ;;  %v428_v62 = vadd.f32 %v422_v61, %v369_v38  ;;  %v1363_v0 = vadd.f32 %v319_v54, %v276_v14  ;;  %v508_v6 = vsel %vm296_vm1, 0.0, %v496_v19 }
  0xec   : > { %v445_v63 = vand.u32 2147483647, %v433_v28  ;;  %v446_v18 = vand.u32 2147483647, %v434_v35  ;;  %v320_v32 = vadd.f32 %v1262_v2, %v302_v58  ;;  %v340_v1 = vrot.slane %v1358_v55, 7 }
  0xed   : > { %v359_v42 = vrot.slane %v1358_v55, 1  ;;  %v417_v3 = vmul.f32 2.0, %v1358_v55  ;;  %v440_v60 = vand.u32 2147483647, %v428_v62  ;;  %v507_v12 = vsel %vm296_vm1, 0.0, %v494_v9 }
  0xee   : > { %v1368_v4 = vadd.f32 %v445_v63, %v439_v59  ;;  %v351_v5 = vsel %vm333_vm3, 0.0, %v340_v1  ;;  %v383_v2 = vrot.slane %v1363_v0, 7  ;;  %v401_v8 = vrot.slane %v1363_v0, 1 }
  0xef   : > { %v526_v15 = vadd.f32 %v1276_v33, %v508_v6  ;;  %v1376_v16 = vadd.f32 %v446_v18, %v440_v60  ;;  %v423_v17 = vadd.f32 %v417_v3, %v351_v5  ;;  %v513_v10 = vsub.f32 %v483_v48, %v507_v12 }
  0xf0   : > { %v525_v52 = vadd.f32 %v1279_v34, %v507_v12  ;;  %v394_v20 = vsel %vm333_vm3, 0.0, %v383_v2  ;;  %v484_v21 = vsel %vm271_vm2, %v472_v7, 0.0  ;;  %v277_v23 = vsel %vm271_vm2, %v264_v13, 0.0 }
  0xf1   : > { %v661_v24 = vsub.f32 %v1368_v4, %v1348_v51  ;;  %v545_v26 = vrot.slane %v513_v10, 7  ;;  %v563_v29 = vrot.slane %v513_v10, 1  ;;  %v621_v36 = vmul.f32 2.0, %v513_v10 }
  0xf2   : > { %v531_v25 = vadd.f32 %v525_v52, %v483_v48  ;;  %v514_v33 = vsub.f32 %v484_v21, %v508_v6  ;;  %v532_v37 = vadd.f32 %v526_v15, %v484_v21  ;;  %v308_v39 = vsub.f32 %v277_v23, %v302_v58 }
  0xf3   : > { %v326_v38 = vadd.f32 %v320_v32, %v277_v23  ;;  %v556_v40 = vsel %vm333_vm3, 0.0, %v545_v26  ;;  %v662_v43 = vsub.f32 %v1376_v16, %v1350_v27  ;;  %v665_v21 = vand.u32 2147483647, %v659_v56 }
  0xf4   : > { %v587_v34 = vrot.slane %v531_v25, 7  ;;  %v605_v41 = vrot.slane %v531_v25, 1  ;;  %v627_v44 = vadd.f32 %v621_v36, %v556_v40  ;;  %v546_v45 = vrot.slane %v514_v33, 7 }
  0xf5   : > { %v564_v47 = vrot.slane %v514_v33, 1  ;;  %v588_v49 = vrot.slane %v532_v37, 7  ;;  %v606_v14 = vrot.slane %v532_v37, 1  ;;  %v622_v19 = vmul.f32 2.0, %v514_v33 }
  0xf6   : > { %v598_v50 = vsel %vm333_vm3, 0.0, %v587_v34  ;;  %v341_v9 = vrot.slane %v308_v39, 7  ;;  %v547_v51 = vsel %vm333_vm3, %v545_v26, %v546_v45  ;;  %v360_v48 = vrot.slane %v308_v39, 1 }
  0xf7   : > { %v565_v53 = vsel %vm352_vm4, %v563_v29, %v564_v47  ;;  %v574_v57 = vsel %vm352_vm4, %v564_v47, 0.0  ;;  %v589_v61 = vsel %vm333_vm3, %v587_v34, %v588_v49  ;;  %v607_v28 = vsel %vm352_vm4, %v605_v41, %v606_v14 }
  0xf8   : > { %v616_v27 = vsel %vm352_vm4, %v606_v14, 0.0  ;;  %v628_v35 = vadd.f32 %v622_v19, %v547_v51  ;;  %v342_v59 = vsel %vm333_vm3, %v340_v1, %v341_v9  ;;  %v639_v54 = vsub.f32 %v598_v50, %v607_v28 }
  0xf9   : > { %v640_v55 = vsub.f32 %v589_v61, %v616_v27  ;;  %v384_v58 = vrot.slane %v326_v38, 7  ;;  %v402_v63 = vrot.slane %v326_v38, 1  ;;  %v418_v18 = vmul.f32 2.0, %v308_v39 }
  0xfa   : > { %v634_v62 = vadd.f32 %v628_v35, %v574_v57  ;;  %v633_v32 = vadd.f32 %v627_v44, %v565_v53  ;;  %v651_v0 = vand.u32 2147483647, %v639_v54  ;;  %v361_v60 = vsel %vm352_vm4, %v359_v42, %v360_v48 }
  0xfb   : > { %v652_v3 = vand.u32 2147483647, %v640_v55  ;;  %v370_v4 = vsel %vm352_vm4, %v360_v48, 0.0  ;;  %v385_v6 = vsel %vm333_vm3, %v383_v2, %v384_v58  ;;  %v403_v12 = vsel %vm352_vm4, %v401_v8, %v402_v63 }
  0xfc   : > { %v412_v1 = vsel %vm352_vm4, %v402_v63, 0.0  ;;  %v424_v7 = vadd.f32 %v418_v18, %v342_v59  ;;  %v435_v13 = vsub.f32 %v394_v20, %v403_v12  ;;  %v429_v15 = vadd.f32 %v423_v17, %v361_v60 }
  0xfd   : > { %v436_v5 = vsub.f32 %v385_v6, %v412_v1  ;;  %v645_v16 = vand.u32 2147483647, %v633_v32  ;;  %v646_v52 = vand.u32 2147483647, %v634_v62  ;;  %v666_v42 = vand.u32 2147483647, %v660_v11 }
  0xfe   : > { %v430_v10 = vadd.f32 %v424_v7, %v370_v4  ;;  %v447_v2 = vand.u32 2147483647, %v435_v13  ;;  %v441_v8 = vand.u32 2147483647, %v429_v15  ;;  %v667_v20 = vand.u32 2147483647, %v661_v24 }
  0xff   : > { %v448_v23 = vand.u32 2147483647, %v436_v5  ;;  %v657_v25 = vadd.f32 %v651_v0, %v645_v16  ;;  %v658_v29 = vadd.f32 %v652_v3, %v646_v52  ;;  %v668_v36 = vand.u32 2147483647, %v662_v43 }
 0x100   : > { %v442_v26 = vand.u32 2147483647, %v430_v10  ;;  %v453_v17 = vadd.f32 %v447_v2, %v441_v8  ;;  %v671_v33 = vsel %vm226_vm0, %v665_v21, 0.0  ;;  %v672_v37 = vsel %vm226_vm0, %v666_v42, 0.0 }
 0x101   : > { %v673_v46 = vadd.f32 %v672_v37, %v671_v33  ;;  %v674_v30 = vsel %vm226_vm0, %v667_v20, 0.0  ;;  %v676_v22 = vsel %vm226_vm0, %v668_v36, 0.0  ;;  %v691_v59 = vlaneseq }
 0x102   : > { %v454_v39 = vadd.f32 %v448_v23, %v442_v26  ;;  %v663_v56 = vsub.f32 %v453_v17, %v657_v25 }
 0x103   : > { %v675_v11 = vadd.f32 %v674_v30, %v673_v46  ;;  %v692_v54 = vshrl.u32 %v691_v59, 7  ;;  %v694_v55 = vand.u32 127, %v691_v59 }
 0x104   : > { %v664_v31 = vsub.f32 %v454_v39, %v658_v29  ;;  %v669_v38 = vand.u32 2147483647, %v663_v56 }
 0x105   : > { %v677_v34 = vadd.f32 %v676_v22, %v675_v11  ;;  %vm695_vm5 = vcmp.eq.s32.totalorder %v692_v54, 0  ;;  %vm696_vm6 = vcmp.eq.s32.totalorder %v694_v55, 0  ;;  %vm700_vm7 = vcmp.eq.s32.totalorder %v694_v55, 1 }
 0x106   : > { %v670_v40 = vand.u32 2147483647, %v664_v31  ;;  %v678_v24 = vsel %vm226_vm0, %v669_v38, 0.0  ;;  %vm697_vm8 = vmand %vm695_vm5, %vm696_vm6 }
 0x107   : > { %v679_v41 = vadd.f32 %v678_v24, %v677_v34  ;;  %vm701_vm9 = vmand %vm695_vm5, %vm700_vm7 }
 0x108   : > { %v680_v43 = vsel %vm226_vm0, %v670_v40, 0.0 }
 0x109   : > { %v681_v44 = vadd.f32 %v680_v43, %v679_v41 }
 0x10b   : > { %682 = vadd.xlane.f32.xlu1 %v681_v44 }
 0x124   : > { %v239_v45 = vpop.xlane.xlu0 %238 }
 0x125   : > { %v240_v47 = vrot.slane %v239_v45, 4 }
 0x127   : > { %v241_v49 = vadd.f32 %v240_v47, %v239_v45 }
 0x129   : > { %v242_v50 = vrot.slane %v241_v49, 2 }
 0x12b   : > { %v243_v14 = vadd.f32 %v242_v50, %v241_v49 }
 0x12d   : > { %v244_v19 = vrot.slane %v243_v14, 1 }
 0x12f   : > { %v245_v9 = vadd.f32 %v244_v19, %v243_v14 }
 0x131   : > { %808 = vpush %v245_v9 }
 0x162   : > { %s809_s18 = spop %808 }
 0x163   : > { %v698_v48 = vstv %s809_s18 }
 0x164   : > { %v699_v62 = vsel %vm697_vm8, %v698_v48, 0.0 }
 0x198   : > { %v683_v51 = vpop.xlane.xlu1 %682 }
 0x199   : > { %v684_v53 = vrot.slane %v683_v51, 4 }
 0x19b   : > { %v685_v57 = vadd.f32 %v684_v53, %v683_v51 }
 0x19d   : > { %v686_v61 = vrot.slane %v685_v57, 2 }
 0x19f   : > { %v687_v28 = vadd.f32 %v686_v61, %v685_v57 }
 0x1a1   : > { %v688_v27 = vrot.slane %v687_v28, 1 }
 0x1a3   : > { %v689_v35 = vadd.f32 %v688_v27, %v687_v28 }
 0x1a5   : > { %810 = vpush %v689_v35 }
 0x1d6   : > { %s811_s30 = spop %810 }
 0x1d7   : > { %v702_v58 = vstv %s811_s30 }
 0x1d8   : > { %v703_v63 = vsel %vm701_vm9, %v702_v58, 0.0 }
 0x1d9   : > { %v704_v18 = vadd.f32 %v703_v63, %v699_v62 }
 0x1db   : > { %705 = vst [vmem:[%s201_s27] sm:$0xff] %v704_v18 }
 0x1dc PF: > { %p15_p11 = scmp.ge.s32.totalorder %s1003_s14, 4   ;;  %s1439_s9 = smov %s950_s10 }
 0x1dd   : > { %s1440_s10 = smov %s954_s11  ;;  %s1441_s11 = smov %s1013_s17 }
 0x1de   : > { %s1442_s12 = smov %s1003_s14  ;;  %17 = sbr.rel (!%p15_p11) target bundleno = 5 (0x5), region = 81 }
 0x1e5   :  { %725 = vsyncpa [#allocation3], 1 }
 0x1e6   :  { %727 = vsyncpa [#allocation3 + $0x1], 1 }
 0x1e7   :  { %728 = vsyncpa [#allocation5], 1 }
 0x1e8   :  { %730 = vsyncpa [#allocation5 + $0x1], 1 }

</bundles_post_ra>
